<compile_context>
chip_gen: v6e
topology: v6e:2x2x1
jax: 0.10.0
libtpu: 0.0.40
codegen_flags: <defaults>
</compile_context>

<pallas_src>
import math

import jax
import jax.numpy as jnp
from jax.experimental import pallas as pl
from jax.experimental.pallas import tpu as pltpu

_K = (2.0 ** 0.5) / math.pi  # matches self.k = 2**0.5 / torch.pi


def _poly_gelu_kernel(x_ref, p_ref, o_ref):
    # x_ref: (tile_rows, H*W); p_ref: (tile_rows, 4) folded per-row params.
    x = x_ref[...]
    p = p_ref[...]
    a = p[:, 0:1]   # alpha * 0.044715 * k
    b = p[:, 1:2]   # beta * k
    g = p[:, 2:3]   # gamma * k
    d = p[:, 3:4]   # delta * 0.5
    # d' * tanh(a'*x^3 + b'*x + g')  ==  delta*0.5*tanh(k*(alpha*0.044715*x^3 + beta*x + gamma))
    t = (a * (x * x) + b) * x + g
    o_ref[...] = d * jnp.tanh(t)


def polynomial_gelu(x_nchw, alpha, beta, gamma, delta, *,
                    target_block_bytes=2 << 20):
    """x_nchw: (N, C, H, W) float32; alpha/beta/gamma/delta: (C,) float32."""
    n, c, h, w = x_nchw.shape
    rows = n * c
    lanes = h * w

    # Free re-layout: NCHW -> (N*C, H*W); row r corresponds to channel r % C.
    x2d = x_nchw.reshape(rows, lanes)

    # Fold scalar constants into per-channel params (O(C) wrapper cost).
    a_f = (alpha * (0.044715 * _K)).astype(x2d.dtype)
    b_f = (beta * _K).astype(x2d.dtype)
    g_f = (gamma * _K).astype(x2d.dtype)
    d_f = (delta * 0.5).astype(x2d.dtype)
    params_c = jnp.stack([a_f, b_f, g_f, d_f], axis=1)   # (C, 4)
    params = jnp.tile(params_c, (n, 1))                  # (N*C, 4)

    # Pick a row tile that moves ~target_block_bytes per grid step, keeping the
    # block row count a multiple of 8 (or the full row extent).  Partial last
    # blocks are handled by Pallas (masked write-back), so no divisibility
    # assert is needed.
    bytes_per_row = lanes * x2d.dtype.itemsize
    tr = max(8, (target_block_bytes // max(bytes_per_row, 1)) // 8 * 8)
    tr = min(tr, rows)
    grid = pl.cdiv(rows, tr)

    x_spec = pl.BlockSpec((tr, lanes), lambda i: (i, 0))   # lane-dense blocks
    p_spec = pl.BlockSpec((tr, 4), lambda i: (i, 0))

    out2d = pl.pallas_call(
        _poly_gelu_kernel,
        out_shape=jax.ShapeDtypeStruct((rows, lanes), x2d.dtype),
        grid_spec=pltpu.PrefetchScalarGridSpec(
            num_scalar_prefetch=0,
            grid=(grid,),
            in_specs=[x_spec, p_spec],
            out_specs=x_spec,
        ),
        compiler_params=pltpu.CompilerParams(
            dimension_semantics=("parallel",)),  # lets v7x shard rows across its 2 TCs
    )(x2d, params)

    # Free reshape back to NCHW.
    return out2d.reshape(n, c, h, w)


def _init_params(key, num_channels):
    ks = jax.random.split(key, 4)

    def unit(k):
        v = jax.random.normal(k, (num_channels,), dtype=jnp.float32)
        return v / jnp.linalg.norm(v)

    return unit(ks[0]), unit(ks[1]), unit(ks[2]), unit(ks[3])


def _reference(x, alpha, beta, gamma, delta):
    a = alpha.reshape(1, -1, 1, 1)
    b = beta.reshape(1, -1, 1, 1)
    g = gamma.reshape(1, -1, 1, 1)
    d = delta.reshape(1, -1, 1, 1)
    poly = a * 0.044715 * (x ** 3) + b * x + g
    return d * 0.5 * jnp.tanh(_K * poly)


if __name__ == "__main__":
    key = jax.random.PRNGKey(0)
    k_x, k_p = jax.random.split(key)

    N, C, H, W = 2, 4, 16, 16
    x = jax.random.normal(k_x, (N, C, H, W), dtype=jnp.float32)
    alpha, beta, gamma, delta = _init_params(k_p, C)

    out = polynomial_gelu(x, alpha, beta, gamma, delta)
    out = jax.block_until_ready(out)

    ref = _reference(x, alpha, beta, gamma, delta)
    assert out.shape == (N, C, H, W)
    assert out.dtype == x.dtype
    # Constant folding reorders a couple of f32 multiplies -> allow a few ULPs.
    assert jnp.allclose(out, ref, atol=1e-5, rtol=1e-5)

    print("KERNEL_OK")
</pallas_src>

<mosaic_0001>
module attributes {stable_mosaic.version = 11 : i64} {
  func.func @_poly_gelu_kernel(%arg0: i32, %arg1: memref<8x256xf32, #tpu.memory_space<vmem>>, %arg2: memref<8x4xf32, #tpu.memory_space<vmem>>, %arg3: memref<8x256xf32, #tpu.memory_space<vmem>>) attributes {dimension_semantics = [#tpu.dimension_semantics<parallel>], iteration_bounds = array<i64: 1>, scalar_prefetch = 0 : i64, scratch_operands = 0 : i64, tpu.core_type = #tpu.core_type<tc>, window_params = [{transform_indices = @transform_0, window_bounds = array<i64: 8, 256>}, {transform_indices = @transform_1, window_bounds = array<i64: 8, 4>}, {transform_indices = @transform_2, window_bounds = array<i64: 8, 256>}]} {
    %c0 = arith.constant 0 : index
    %c0_0 = arith.constant 0 : index
    %0 = vector.load %arg1[%c0, %c0_0] : memref<8x256xf32, #tpu.memory_space<vmem>>, vector<8x256xf32>
    %c0_1 = arith.constant 0 : index
    %c0_2 = arith.constant 0 : index
    %1 = vector.load %arg2[%c0_1, %c0_2] : memref<8x4xf32, #tpu.memory_space<vmem>>, vector<8x4xf32>
    %2 = vector.extract_strided_slice %1 {offsets = [0, 0], sizes = [8, 1], strides = [1, 1]} : vector<8x4xf32> to vector<8x1xf32>
    %3 = vector.extract_strided_slice %1 {offsets = [0, 1], sizes = [8, 1], strides = [1, 1]} : vector<8x4xf32> to vector<8x1xf32>
    %4 = vector.extract_strided_slice %1 {offsets = [0, 2], sizes = [8, 1], strides = [1, 1]} : vector<8x4xf32> to vector<8x1xf32>
    %5 = vector.extract_strided_slice %1 {offsets = [0, 3], sizes = [8, 1], strides = [1, 1]} : vector<8x4xf32> to vector<8x1xf32>
    %6 = arith.mulf %0, %0 : vector<8x256xf32>
    %7 = vector.broadcast %2 : vector<8x1xf32> to vector<8x256xf32>
    %8 = arith.mulf %7, %6 : vector<8x256xf32>
    %9 = vector.broadcast %3 : vector<8x1xf32> to vector<8x256xf32>
    %10 = arith.addf %8, %9 : vector<8x256xf32>
    %11 = arith.mulf %10, %0 : vector<8x256xf32>
    %12 = vector.broadcast %4 : vector<8x1xf32> to vector<8x256xf32>
    %13 = arith.addf %11, %12 : vector<8x256xf32>
    %14 = math.tanh %13 : vector<8x256xf32>
    %15 = vector.broadcast %5 : vector<8x1xf32> to vector<8x256xf32>
    %16 = arith.mulf %15, %14 : vector<8x256xf32>
    %c0_3 = arith.constant 0 : index
    %c0_4 = arith.constant 0 : index
    %17 = vector.load %arg3[%c0_3, %c0_4] : memref<8x256xf32, #tpu.memory_space<vmem>>, vector<8x256xf32>
    tpu.vector_store %arg3[%c0_3, %c0_4], %16 {strides = array<i32>} : memref<8x256xf32, #tpu.memory_space<vmem>>, vector<8x256xf32>,
    return
  }
  func.func @transform_0(%arg0: i32) -> (i32, i32) {
    %c0_i32 = arith.constant 0 : i32
    %c0_i32_0 = arith.constant 0 : i32
    return %arg0, %c0_i32 : i32, i32
  }
  func.func @transform_1(%arg0: i32) -> (i32, i32) {
    %c0_i32 = arith.constant 0 : i32
    %c0_i32_0 = arith.constant 0 : i32
    return %arg0, %c0_i32 : i32, i32
  }
  func.func @transform_2(%arg0: i32) -> (i32, i32) {
    %c0_i32 = arith.constant 0 : i32
    %c0_i32_0 = arith.constant 0 : i32
    return %arg0, %c0_i32 : i32, i32
  }
}

</mosaic_0001>

<bundles_post_ra>
// kernel: tpu_custom_call.1
= control target key start
LH: loop header
LB: loop body
LE: loop exit
PB: predicated region body
PF: predicated region fallthrough
CT: control target
= control target key end

     0   :  { %7 = vsyncpa [#allocation3], 0  ;;  %s164_s0 = inlined_call_operand.hbm [shape: f32[8,256], index: 0, kind: input, shape index: {}]   ;;  %s165_s1 = inlined_call_operand.vmem [shape: f32[8,4], index: 1, kind: input, shape index: {}]   ;;  %s166_s2 = inlined_call_operand.hbm [shape: f32[8,256], index: 2, kind: output, shape index: {}]  }
   0x1   :  { %8 = vsyncpa [#allocation4], 0  ;;  %s134_s9 = smov [#allocation2]  }
   0x2   :  { %s15_s10 = sshll.u32 %s134_s9, 4  ;;  %s16_s10 = int_to_ptr.vmem [resolvable:$true] %s15_s10 }
   0x3   :  { %s98_s11 = scalar_lea.vmem %s16_s10, 256  ;;  %p103_p1 = scmp.lt.s32.totalorder %s16_s10, %s16_s10 }
   0x4   :  { %p99_p0 = scmp.ne.s32.totalorder %s16_s10, %s98_s11  ;;  %p104_p2 = scmp.lt.s32.totalorder %s98_s11, %s98_s11 }
   0x6   :  { %p105_p3 = por %p104_p2, %p103_p1 }
   0x8   :  { %p106_p4 = pnand %p105_p3, %p99_p0 }
   0xa   :  { %109 = shalt.err (!%p106_p4)
}
   0xb   :  { %18 = dma.hbm_to_vmem [thread:$0]  %s164_s0, 256, %s16_s10, [#allocation3]  }
   0xc   :  { %130 = dma.done.wait [#allocation3], 256  }
   0xd   :  { %131 = vsyncadd [#allocation3], 4294967040  ;;  %v135_v0 = vmov 0   ;;  %v136_v1 = vmov 2   ;;  %v26_v2 = vld [vmem:[%s165_s1] sm:$0xff]  ;;  %v137_v3 = vmov 1  }
   0xe   :  { %81 = vset.pattern.permute.xlu0 %v135_v0  ;;  %83 = vset.pattern.permute.xlu1 %v136_v1  ;;  %v138_v4 = vmov 3   ;;  %v24_v5 = vld [vmem:[#allocation2] sm:$0xff]  ;;  %v25_v6 = vld [vmem:[#allocation2 + $0x8] sm:$0xff]  ;;  %s139_s0 = smov [#allocation5]  }
   0xf   :  { %31 = vperm.xlu0 %81, %v26_v2   ;;  %45 = vperm.xlu1 %83, %v26_v2   ;;  %v27_v8 = vmul.f32 %v24_v5, %v24_v5  ;;  %v28_v9 = vmul.f32 %v25_v6, %v25_v6  ;;  %s66_s1 = sshll.u32 %s139_s0, 4  ;;  %s67_s1 = int_to_ptr.vmem [resolvable:$true] %s66_s1 }
  0x10   :  { %s110_s16 = scalar_lea.vmem %s67_s1, 256  ;;  %p115_p6 = scmp.lt.s32.totalorder %s67_s1, %s67_s1 }
  0x11   :  { %p111_p5 = scmp.ne.s32.totalorder %s67_s1, %s110_s16  ;;  %p116_p7 = scmp.lt.s32.totalorder %s110_s16, %s110_s16 }
  0x13   :  { %82 = vset.pattern.permute.xlu0 %v137_v3  ;;  %84 = vset.pattern.permute.xlu1 %v138_v4  ;;  %p117_p8 = por %p116_p7, %p115_p6 }
  0x14   :  { %37 = vperm.xlu0 %82, %v26_v2   ;;  %53 = vperm.xlu1 %84, %v26_v2  }
  0x15   :  { %p118_p9 = pnand %p117_p8, %p111_p5 }
  0x18   :  { %85 = vset.pattern.permute.xlu0 %v138_v4 }
  0x8a   :  { %v32_v7 = vpop.permute.xlu0 %31  ;;  %v46_v15 = vpop.permute.xlu1 %45 }
  0x8b   :  { %v34_v10 = vmul.f32 %v32_v7, %v27_v8  ;;  %v35_v11 = vmul.f32 %v32_v7, %v28_v9 }
  0x8f   :  { %v38_v12 = vpop.permute.xlu0 %37  ;;  %v54_v20 = vpop.permute.xlu1 %53 }
  0x90   :  { %v40_v13 = vadd.f32 %v38_v12, %v34_v10  ;;  %v41_v14 = vadd.f32 %v38_v12, %v35_v11 }
  0x92   :  { %v42_v16 = vmul.f32 %v40_v13, %v24_v5  ;;  %v43_v17 = vmul.f32 %v41_v14, %v25_v6 }
  0x94   :  { %v48_v18 = vadd.f32 %v46_v15, %v42_v16  ;;  %v49_v19 = vadd.f32 %v46_v15, %v43_v17 }
  0x96   :  { %86 = vtanh.f32 %v48_v18 }
  0x97   :  { %88 = vtanh.f32 %v49_v19 }
  0xa3   :  { %v87_v21 = vpop.eup %86 }
  0xa4   :  { %v89_v22 = vpop.eup %88  ;;  %v56_v23 = vmul.f32 %v87_v21, %v54_v20 }
  0xa5   :  { %v57_v24 = vmul.f32 %v89_v22, %v54_v20 }
  0xa6   :  { %58 = vst [vmem:[#allocation5] sm:$0xff] %v56_v23 }
  0xa7   :  { %59 = vst [vmem:[#allocation5 + $0x8] sm:$0xff] %v57_v24 }
  0xa8   :  { %121 = shalt.err (!%p118_p9)
}
  0xa9   :  { %69 = dma.vmem_to_hbm [thread:$0]  %s67_s1, 256, %s166_s2, [#allocation4]  }
  0xaa   :  { %132 = dma.done.wait [#allocation4], 256  }
  0xab   :  { %133 = vsyncadd [#allocation4], 4294967040 }
  0xac   :  { %73 = vsyncpa [#allocation3], 1 }
  0xad   :  { %74 = vsyncpa [#allocation4], 1 }

</bundles_post_ra>
